<compile_context>
chip_gen: v7x
topology: tpu7x:2x2x1
jax: 0.10.0
libtpu: 0.0.40
codegen_flags: <defaults>
</compile_context>

<pallas_src>
import math

import jax
import jax.numpy as jnp
from jax import lax
from jax.experimental import pallas as pl
from jax.experimental.pallas import tpu as pltpu

EPS = 1e-5


# ----------------------------------------------------------------------------
# Kernel
# ----------------------------------------------------------------------------
def _make_kernel(N, H, W, C):
    NH, WC = N * H, W * C
    inv_cnt = 1.0 / float(N * H * W)          # BN count per channel
    assert W & (W - 1) == 0, "roll-tree BN reduction assumes W is a power of 2"
    log2w = int(math.log2(W))

    def kernel(x_ref, w1_ref, w2_ref, gb1_ref, bb1_ref, gb2_ref, bb2_ref,
               o_ref):
        x2d = x_ref[...]                                   # (NH, WC) lane-dense

        # Row masks for the kh = 0 / 2 taps (zero across image boundaries;
        # also kills the wrap-around rows of the sublane rolls).
        row = lax.broadcasted_iota(jnp.int32, (NH, 1), 0)
        has_up = (row % H) != 0
        has_dn = (row % H) != (H - 1)

        def conv3x3(y, w_ref):
            # up[r] = y[r-1], dn[r] = y[r+1]  (masked at image boundaries).
            up = jnp.where(has_up, pltpu.roll(y, 1, 0), 0.0)
            dn = jnp.where(has_dn, pltpu.roll(y, NH - 1, 0), 0.0)
            # kh taps folded into K: single (NH, 3*WC) x (3*WC, WC) matmul.
            ycat = jnp.concatenate([up, y, dn], axis=1)
            return jnp.dot(ycat, w_ref[...],
                           preferred_element_type=jnp.float32)
            # conv bias dropped: exactly cancelled by BN mean subtraction.

        def batchnorm(y, gamma, beta):
            # Single-pass batch stats (f32).  Per-channel reduction across the
            # fused W*C lanes via a log2(W) roll-and-add tree on the XLU; the
            # result is already broadcast to every lane (no relayout needed).
            s = jnp.sum(y, axis=0, keepdims=True)           # (1, WC)
            s2 = jnp.sum(y * y, axis=0, keepdims=True)      # (1, WC)
            red = jnp.concatenate([s, s2], axis=0)          # (2, WC)
            shift = C
            for _ in range(log2w):
                red = red + pltpu.roll(red, shift, 1)
                shift *= 2
            mean = red[0:1] * inv_cnt
            var = red[1:2] * inv_cnt - mean * mean
            scale = gamma * lax.rsqrt(var + EPS)             # fold BN affine
            return y * scale + (beta - mean * scale)

        y = conv3x3(x2d, w1_ref)
        y = jnp.maximum(batchnorm(y, gb1_ref[...], bb1_ref[...]), 0.0)
        z = conv3x3(y, w2_ref)
        z = batchnorm(z, gb2_ref[...], bb2_ref[...])
        o_ref[...] = jnp.maximum(z + x2d, 0.0)              # residual + relu

    return kernel


# ----------------------------------------------------------------------------
# Parameter prep (run ONCE, not per forward)
# ----------------------------------------------------------------------------
def _banded_weights_cat(w_torch, W):
    """torch conv weight (Cout, Cin, 3, 3) -> (3*W*C, W*C) banded matrix.

    Row block kh in {0:up, 1:center, 2:down};
    banded[kh*WC + w_in*C + ci, w_out*C + co] = w[co, ci, kh, w_in - w_out + 1]
    for |w_in - w_out| <= 1, else 0 (kw taps + 'same' W-padding baked in).
    """
    C = w_torch.shape[0]
    wk = jnp.transpose(w_torch.astype(jnp.float32), (2, 3, 1, 0))  # (3,3,Ci,Co)
    widx = jnp.arange(W)
    dw = widx[:, None] - widx[None, :]                       # w_in - w_out
    valid = (jnp.abs(dw) <= 1).astype(jnp.float32)           # (W, W)
    kw = jnp.clip(dw + 1, 0, 2)                              # (W, W)
    sel = wk[:, kw, :, :] * valid[None, :, :, None, None]    # (3, W, W, Ci, Co)
    banded = jnp.transpose(sel, (0, 1, 3, 2, 4))             # (3, W, Ci, W, Co)
    return banded.reshape(3 * W * C, W * C)


def prepare_resblock_params(params, W):
    """Precompute all kernel-side weight material once."""
    w1, b1, g1, be1, w2, b2, g2, be2 = params   # conv biases unused (BN cancels)
    C = w1.shape[0]
    WC = W * C
    row = lambda v: jnp.tile(v.astype(jnp.float32), W).reshape(1, WC)
    return (_banded_weights_cat(w1, W), _banded_weights_cat(w2, W),
            row(g1), row(be1), row(g2), row(be2))


# ----------------------------------------------------------------------------
# Forward wrapper
# ----------------------------------------------------------------------------
@jax.jit
def resblock_forward(x_nchw, kparams):
    """x_nchw: (N, C, H, W) float32.  kparams from prepare_resblock_params."""
    wcat1, wcat2, g1r, b1r, g2r, b2r = kparams
    N, C, H, W = x_nchw.shape
    NH, WC = N * H, W * C

    # fused lane-dense layout: (N, H, W, C) -> (N*H, W*C)
    x2d = jnp.transpose(x_nchw, (0, 2, 3, 1)).astype(jnp.float32).reshape(NH, WC)

    vmem = pl.BlockSpec(memory_space=pltpu.MemorySpace.VMEM)
    out2d = pl.pallas_call(
        _make_kernel(N, H, W, C),
        out_shape=jax.ShapeDtypeStruct((NH, WC), jnp.float32),
        in_specs=[vmem] * 7,
        out_specs=vmem,
    )(x2d, wcat1, wcat2, g1r, b1r, g2r, b2r)

    return jnp.transpose(out2d.reshape(N, H, W, C), (0, 3, 1, 2))


# ----------------------------------------------------------------------------
# Pure-JAX reference (includes the conv biases, to verify they truly cancel)
# ----------------------------------------------------------------------------
def resblock_reference(x_nchw, params):
    w1, b1, g1, be1, w2, b2, g2, be2 = params
    x = jnp.transpose(x_nchw, (0, 2, 3, 1))

    def conv(x, w, b):
        wk = jnp.transpose(w, (2, 3, 1, 0))  # HWIO
        y = lax.conv_general_dilated(
            x, wk, window_strides=(1, 1), padding='SAME',
            dimension_numbers=('NHWC', 'HWIO', 'NHWC'))
        return y + b

    def bn(y, g, be):
        m = jnp.mean(y, axis=(0, 1, 2), keepdims=True)
        v = jnp.mean((y - m) ** 2, axis=(0, 1, 2), keepdims=True)
        return (y - m) * lax.rsqrt(v + EPS) * g + be

    y = jnp.maximum(bn(conv(x, w1, b1), g1, be1), 0.0)
    z = bn(conv(y, w2, b2), g2, be2)
    out = jnp.maximum(z + x, 0.0)
    return jnp.transpose(out, (0, 3, 1, 2))


if __name__ == "__main__":
    N, C, H, W = 2, 8, 16, 16  # hidden_size = 8 -> W*C = 128 (lane-dense)

    key = jax.random.PRNGKey(0)
    k = jax.random.split(key, 5)
    x = jax.random.normal(k[0], (N, C, H, W), jnp.float32)

    # Deterministic parameter init (PyTorch weight shape conventions).
    w1 = 0.1 * jax.random.normal(k[1], (C, C, 3, 3), jnp.float32)
    b1 = 0.05 * jax.random.normal(k[2], (C,), jnp.float32)
    w2 = 0.1 * jax.random.normal(k[3], (C, C, 3, 3), jnp.float32)
    b2 = 0.05 * jax.random.normal(k[4], (C,), jnp.float32)
    g1 = jnp.ones((C,), jnp.float32)    # BatchNorm gamma init
    be1 = jnp.zeros((C,), jnp.float32)  # BatchNorm beta init
    g2 = jnp.ones((C,), jnp.float32)
    be2 = jnp.zeros((C,), jnp.float32)
    params = (w1, b1, g1, be1, w2, b2, g2, be2)

    # Weight material prepared once, outside the per-call hot path.
    kparams = jax.block_until_ready(prepare_resblock_params(params, W))

    out = jax.block_until_ready(resblock_forward(x, kparams))
    ref = jax.block_until_ready(resblock_reference(x, params))

    assert out.shape == (N, C, H, W)
    assert jnp.allclose(out, ref, atol=1e-3, rtol=1e-3)
    print("KERNEL_OK")
</pallas_src>

<mosaic_0001>
module attributes {stable_mosaic.version = 11 : i64} {
  func.func @kernel(%arg0: memref<32x128xf32, #tpu.memory_space<vmem>>, %arg1: memref<384x128xf32, #tpu.memory_space<vmem>>, %arg2: memref<384x128xf32, #tpu.memory_space<vmem>>, %arg3: memref<1x128xf32, #tpu.memory_space<vmem>>, %arg4: memref<1x128xf32, #tpu.memory_space<vmem>>, %arg5: memref<1x128xf32, #tpu.memory_space<vmem>>, %arg6: memref<1x128xf32, #tpu.memory_space<vmem>>, %arg7: memref<32x128xf32, #tpu.memory_space<vmem>>) attributes {dimension_semantics = [], scalar_prefetch = 0 : i64, scratch_operands = 0 : i64, tpu.core_type = #tpu.core_type<tc>} {
    %c0 = arith.constant 0 : index
    %c0_0 = arith.constant 0 : index
    %0 = vector.load %arg0[%c0, %c0_0] : memref<32x128xf32, #tpu.memory_space<vmem>>, vector<32x128xf32>
    %1 = tpu.iota {dimensions = array<i32: 0>} : vector<32x1xi32>
    %c16_i32 = arith.constant 16 : i32
    %c0_i32 = arith.constant 0 : i32
    %2 = arith.cmpi eq, %c16_i32, %c0_i32 : i32
    %c1_i32 = arith.constant 1 : i32
    %3 = arith.select %2, %c1_i32, %c16_i32 : i32
    %4 = vector.broadcast %3 : i32 to vector<32x1xi32>
    %5 = arith.remsi %1, %4 : vector<32x1xi32>
    %c0_i32_1 = arith.constant 0 : i32
    %6 = vector.broadcast %c0_i32_1 : i32 to vector<32x1xi32>
    %7 = arith.cmpi ne, %5, %6 : vector<32x1xi32>
    %c0_i32_2 = arith.constant 0 : i32
    %8 = vector.broadcast %c0_i32_2 : i32 to vector<32x1xi32>
    %9 = arith.cmpi slt, %5, %8 : vector<32x1xi32>
    %c0_i32_3 = arith.constant 0 : i32
    %10 = arith.cmpi slt, %3, %c0_i32_3 : i32
    %11 = vector.broadcast %10 : i1 to vector<32x1xi1>
    %12 = vector.broadcast %11 : vector<32x1xi1> to vector<32x1xi1>
    %13 = arith.xori %9, %12 : vector<32x1xi1>
    %14 = arith.andi %13, %7 : vector<32x1xi1>
    %15 = vector.broadcast %3 : i32 to vector<32x1xi32>
    %16 = arith.addi %5, %15 : vector<32x1xi32>
    %17 = arith.select %14, %16, %5 : vector<32x1xi1>, vector<32x1xi32>
    %c0_i32_4 = arith.constant 0 : i32
    %18 = vector.broadcast %c0_i32_4 : i32 to vector<32x1xi32>
    %19 = arith.cmpi ne, %17, %18 : vector<32x1xi32>
    %c16_i32_5 = arith.constant 16 : i32
    %c0_i32_6 = arith.constant 0 : i32
    %20 = arith.cmpi eq, %c16_i32_5, %c0_i32_6 : i32
    %c1_i32_7 = arith.constant 1 : i32
    %21 = arith.select %20, %c1_i32_7, %c16_i32_5 : i32
    %22 = vector.broadcast %21 : i32 to vector<32x1xi32>
    %23 = arith.remsi %1, %22 : vector<32x1xi32>
    %c0_i32_8 = arith.constant 0 : i32
    %24 = vector.broadcast %c0_i32_8 : i32 to vector<32x1xi32>
    %25 = arith.cmpi ne, %23, %24 : vector<32x1xi32>
    %c0_i32_9 = arith.constant 0 : i32
    %26 = vector.broadcast %c0_i32_9 : i32 to vector<32x1xi32>
    %27 = arith.cmpi slt, %23, %26 : vector<32x1xi32>
    %c0_i32_10 = arith.constant 0 : i32
    %28 = arith.cmpi slt, %21, %c0_i32_10 : i32
    %29 = vector.broadcast %28 : i1 to vector<32x1xi1>
    %30 = vector.broadcast %29 : vector<32x1xi1> to vector<32x1xi1>
    %31 = arith.xori %27, %30 : vector<32x1xi1>
    %32 = arith.andi %31, %25 : vector<32x1xi1>
    %33 = vector.broadcast %21 : i32 to vector<32x1xi32>
    %34 = arith.addi %23, %33 : vector<32x1xi32>
    %35 = arith.select %32, %34, %23 : vector<32x1xi1>, vector<32x1xi32>
    %c15_i32 = arith.constant 15 : i32
    %36 = vector.broadcast %c15_i32 : i32 to vector<32x1xi32>
    %37 = arith.cmpi ne, %35, %36 : vector<32x1xi32>
    %c1_i32_11 = arith.constant 1 : i32
    %38 = tpu.dynamic_rotate %0 by %c1_i32_11 dim 0 : vector<32x128xf32>, i32 -> vector<32x128xf32>
    %cst = arith.constant 0.000000e+00 : f32
    %39 = vector.shape_cast %19 : vector<32x1xi1> to vector<32x1xi1>
    %40 = vector.broadcast %39 : vector<32x1xi1> to vector<32x128xi1>
    %41 = vector.broadcast %cst : f32 to vector<32x128xf32>
    %42 = arith.select %40, %38, %41 : vector<32x128xi1>, vector<32x128xf32>
    %c31_i32 = arith.constant 31 : i32
    %43 = tpu.dynamic_rotate %0 by %c31_i32 dim 0 : vector<32x128xf32>, i32 -> vector<32x128xf32>
    %cst_12 = arith.constant 0.000000e+00 : f32
    %44 = vector.shape_cast %37 : vector<32x1xi1> to vector<32x1xi1>
    %45 = vector.broadcast %44 : vector<32x1xi1> to vector<32x128xi1>
    %46 = vector.broadcast %cst_12 : f32 to vector<32x128xf32>
    %47 = arith.select %45, %43, %46 : vector<32x128xi1>, vector<32x128xf32>
    %48 = tpu.concatenate %42, %0, %47 in 1 : vector<32x128xf32>, vector<32x128xf32>, vector<32x128xf32> -> vector<32x384xf32>
    %c0_13 = arith.constant 0 : index
    %c0_14 = arith.constant 0 : index
    %49 = vector.load %arg1[%c0_13, %c0_14] : memref<384x128xf32, #tpu.memory_space<vmem>>, vector<384x128xf32>
    %cst_15 = arith.constant dense<0.000000e+00> : vector<32x128xf32>
    %50 = tpu.matmul %48, %49, %cst_15 {dimension_numbers = #tpu.dot_dimension_numbers<[1], [0], [0], [1], [0, 0, 1, 1], [], []>} : vector<32x384xf32>, vector<384x128xf32>, vector<32x128xf32> -> vector<32x128xf32>
    %c0_16 = arith.constant 0 : index
    %c0_17 = arith.constant 0 : index
    %51 = vector.load %arg3[%c0_16, %c0_17] : memref<1x128xf32, #tpu.memory_space<vmem>>, vector<1x128xf32>
    %c0_18 = arith.constant 0 : index
    %c0_19 = arith.constant 0 : index
    %52 = vector.load %arg4[%c0_18, %c0_19] : memref<1x128xf32, #tpu.memory_space<vmem>>, vector<1x128xf32>
    %cst_20 = arith.constant dense<0.000000e+00> : vector<128xf32>
    %53 = vector.multi_reduction <add>, %50, %cst_20 [0] : vector<32x128xf32> to vector<128xf32>
    %54 = vector.shape_cast %53 : vector<128xf32> to vector<1x128xf32>
    %55 = arith.mulf %50, %50 : vector<32x128xf32>
    %cst_21 = arith.constant dense<0.000000e+00> : vector<128xf32>
    %56 = vector.multi_reduction <add>, %55, %cst_21 [0] : vector<32x128xf32> to vector<128xf32>
    %57 = vector.shape_cast %56 : vector<128xf32> to vector<1x128xf32>
    %58 = tpu.concatenate %54, %57 in 0 : vector<1x128xf32>, vector<1x128xf32> -> vector<2x128xf32>
    %c8_i32 = arith.constant 8 : i32
    %59 = tpu.dynamic_rotate %58 by %c8_i32 dim 1 : vector<2x128xf32>, i32 -> vector<2x128xf32>
    %60 = arith.addf %58, %59 : vector<2x128xf32>
    %c16_i32_22 = arith.constant 16 : i32
    %61 = tpu.dynamic_rotate %60 by %c16_i32_22 dim 1 : vector<2x128xf32>, i32 -> vector<2x128xf32>
    %62 = arith.addf %60, %61 : vector<2x128xf32>
    %c32_i32 = arith.constant 32 : i32
    %63 = tpu.dynamic_rotate %62 by %c32_i32 dim 1 : vector<2x128xf32>, i32 -> vector<2x128xf32>
    %64 = arith.addf %62, %63 : vector<2x128xf32>
    %c64_i32 = arith.constant 64 : i32
    %65 = tpu.dynamic_rotate %64 by %c64_i32 dim 1 : vector<2x128xf32>, i32 -> vector<2x128xf32>
    %66 = arith.addf %64, %65 : vector<2x128xf32>
    %67 = vector.extract_strided_slice %66 {offsets = [0, 0], sizes = [1, 128], strides = [1, 1]} : vector<2x128xf32> to vector<1x128xf32>
    %cst_23 = arith.constant 0.001953125 : f32
    %68 = vector.broadcast %cst_23 : f32 to vector<1x128xf32>
    %69 = arith.mulf %67, %68 : vector<1x128xf32>
    %70 = vector.extract_strided_slice %66 {offsets = [1, 0], sizes = [1, 128], strides = [1, 1]} : vector<2x128xf32> to vector<1x128xf32>
    %cst_24 = arith.constant 0.001953125 : f32
    %71 = vector.broadcast %cst_24 : f32 to vector<1x128xf32>
    %72 = arith.mulf %70, %71 : vector<1x128xf32>
    %73 = arith.mulf %69, %69 : vector<1x128xf32>
    %74 = arith.subf %72, %73 : vector<1x128xf32>
    %cst_25 = arith.constant 9.99999974E-6 : f32
    %75 = vector.broadcast %cst_25 : f32 to vector<1x128xf32>
    %76 = arith.addf %74, %75 : vector<1x128xf32>
    %77 = math.rsqrt %76 : vector<1x128xf32>
    %78 = arith.mulf %51, %77 : vector<1x128xf32>
    %79 = vector.broadcast %78 : vector<1x128xf32> to vector<32x128xf32>
    %80 = arith.mulf %50, %79 : vector<32x128xf32>
    %81 = arith.mulf %69, %78 : vector<1x128xf32>
    %82 = arith.subf %52, %81 : vector<1x128xf32>
    %83 = vector.broadcast %82 : vector<1x128xf32> to vector<32x128xf32>
    %84 = arith.addf %80, %83 : vector<32x128xf32>
    %cst_26 = arith.constant 0.000000e+00 : f32
    %85 = vector.broadcast %cst_26 : f32 to vector<32x128xf32>
    %86 = arith.maximumf %84, %85 : vector<32x128xf32>
    %c1_i32_27 = arith.constant 1 : i32
    %87 = tpu.dynamic_rotate %86 by %c1_i32_27 dim 0 : vector<32x128xf32>, i32 -> vector<32x128xf32>
    %cst_28 = arith.constant 0.000000e+00 : f32
    %88 = vector.shape_cast %19 : vector<32x1xi1> to vector<32x1xi1>
    %89 = vector.broadcast %88 : vector<32x1xi1> to vector<32x128xi1>
    %90 = vector.broadcast %cst_28 : f32 to vector<32x128xf32>
    %91 = arith.select %89, %87, %90 : vector<32x128xi1>, vector<32x128xf32>
    %c31_i32_29 = arith.constant 31 : i32
    %92 = tpu.dynamic_rotate %86 by %c31_i32_29 dim 0 : vector<32x128xf32>, i32 -> vector<32x128xf32>
    %cst_30 = arith.constant 0.000000e+00 : f32
    %93 = vector.shape_cast %37 : vector<32x1xi1> to vector<32x1xi1>
    %94 = vector.broadcast %93 : vector<32x1xi1> to vector<32x128xi1>
    %95 = vector.broadcast %cst_30 : f32 to vector<32x128xf32>
    %96 = arith.select %94, %92, %95 : vector<32x128xi1>, vector<32x128xf32>
    %97 = tpu.concatenate %91, %86, %96 in 1 : vector<32x128xf32>, vector<32x128xf32>, vector<32x128xf32> -> vector<32x384xf32>
    %c0_31 = arith.constant 0 : index
    %c0_32 = arith.constant 0 : index
    %98 = vector.load %arg2[%c0_31, %c0_32] : memref<384x128xf32, #tpu.memory_space<vmem>>, vector<384x128xf32>
    %cst_33 = arith.constant dense<0.000000e+00> : vector<32x128xf32>
    %99 = tpu.matmul %97, %98, %cst_33 {dimension_numbers = #tpu.dot_dimension_numbers<[1], [0], [0], [1], [0, 0, 1, 1], [], []>} : vector<32x384xf32>, vector<384x128xf32>, vector<32x128xf32> -> vector<32x128xf32>
    %c0_34 = arith.constant 0 : index
    %c0_35 = arith.constant 0 : index
    %100 = vector.load %arg5[%c0_34, %c0_35] : memref<1x128xf32, #tpu.memory_space<vmem>>, vector<1x128xf32>
    %c0_36 = arith.constant 0 : index
    %c0_37 = arith.constant 0 : index
    %101 = vector.load %arg6[%c0_36, %c0_37] : memref<1x128xf32, #tpu.memory_space<vmem>>, vector<1x128xf32>
    %cst_38 = arith.constant dense<0.000000e+00> : vector<128xf32>
    %102 = vector.multi_reduction <add>, %99, %cst_38 [0] : vector<32x128xf32> to vector<128xf32>
    %103 = vector.shape_cast %102 : vector<128xf32> to vector<1x128xf32>
    %104 = arith.mulf %99, %99 : vector<32x128xf32>
    %cst_39 = arith.constant dense<0.000000e+00> : vector<128xf32>
    %105 = vector.multi_reduction <add>, %104, %cst_39 [0] : vector<32x128xf32> to vector<128xf32>
    %106 = vector.shape_cast %105 : vector<128xf32> to vector<1x128xf32>
    %107 = tpu.concatenate %103, %106 in 0 : vector<1x128xf32>, vector<1x128xf32> -> vector<2x128xf32>
    %c8_i32_40 = arith.constant 8 : i32
    %108 = tpu.dynamic_rotate %107 by %c8_i32_40 dim 1 : vector<2x128xf32>, i32 -> vector<2x128xf32>
    %109 = arith.addf %107, %108 : vector<2x128xf32>
    %c16_i32_41 = arith.constant 16 : i32
    %110 = tpu.dynamic_rotate %109 by %c16_i32_41 dim 1 : vector<2x128xf32>, i32 -> vector<2x128xf32>
    %111 = arith.addf %109, %110 : vector<2x128xf32>
    %c32_i32_42 = arith.constant 32 : i32
    %112 = tpu.dynamic_rotate %111 by %c32_i32_42 dim 1 : vector<2x128xf32>, i32 -> vector<2x128xf32>
    %113 = arith.addf %111, %112 : vector<2x128xf32>
    %c64_i32_43 = arith.constant 64 : i32
    %114 = tpu.dynamic_rotate %113 by %c64_i32_43 dim 1 : vector<2x128xf32>, i32 -> vector<2x128xf32>
    %115 = arith.addf %113, %114 : vector<2x128xf32>
    %116 = vector.extract_strided_slice %115 {offsets = [0, 0], sizes = [1, 128], strides = [1, 1]} : vector<2x128xf32> to vector<1x128xf32>
    %cst_44 = arith.constant 0.001953125 : f32
    %117 = vector.broadcast %cst_44 : f32 to vector<1x128xf32>
    %118 = arith.mulf %116, %117 : vector<1x128xf32>
    %119 = vector.extract_strided_slice %115 {offsets = [1, 0], sizes = [1, 128], strides = [1, 1]} : vector<2x128xf32> to vector<1x128xf32>
    %cst_45 = arith.constant 0.001953125 : f32
    %120 = vector.broadcast %cst_45 : f32 to vector<1x128xf32>
    %121 = arith.mulf %119, %120 : vector<1x128xf32>
    %122 = arith.mulf %118, %118 : vector<1x128xf32>
    %123 = arith.subf %121, %122 : vector<1x128xf32>
    %cst_46 = arith.constant 9.99999974E-6 : f32
    %124 = vector.broadcast %cst_46 : f32 to vector<1x128xf32>
    %125 = arith.addf %123, %124 : vector<1x128xf32>
    %126 = math.rsqrt %125 : vector<1x128xf32>
    %127 = arith.mulf %100, %126 : vector<1x128xf32>
    %128 = vector.broadcast %127 : vector<1x128xf32> to vector<32x128xf32>
    %129 = arith.mulf %99, %128 : vector<32x128xf32>
    %130 = arith.mulf %118, %127 : vector<1x128xf32>
    %131 = arith.subf %101, %130 : vector<1x128xf32>
    %132 = vector.broadcast %131 : vector<1x128xf32> to vector<32x128xf32>
    %133 = arith.addf %129, %132 : vector<32x128xf32>
    %134 = arith.addf %133, %0 : vector<32x128xf32>
    %cst_47 = arith.constant 0.000000e+00 : f32
    %135 = vector.broadcast %cst_47 : f32 to vector<32x128xf32>
    %136 = arith.maximumf %134, %135 : vector<32x128xf32>
    %c0_48 = arith.constant 0 : index
    %c0_49 = arith.constant 0 : index
    %137 = vector.load %arg7[%c0_48, %c0_49] : memref<32x128xf32, #tpu.memory_space<vmem>>, vector<32x128xf32>
    tpu.vector_store %arg7[%c0_48, %c0_49], %136 {strides = array<i32>} : memref<32x128xf32, #tpu.memory_space<vmem>>, vector<32x128xf32>,
    return
  }
}

</mosaic_0001>

<bundles_post_ra>
// kernel: resblock_forward.1
= control target key start
LH: loop header
LB: loop body
LE: loop exit
PB: predicated region body
PF: predicated region fallthrough
CT: control target
= control target key end

     0   :  { %v30_v39 = vlaneseq  ;;  %vm375_vm6 = vcmask 1040384   ;;  %s1135_s13 = smov 32   ;;  %s1136_s26 = smov 64   ;;  %s1666_s1 = inlined_call_operand.vmem [shape: f32[384,128], index: 1, kind: input, shape index: {}]   ;;  %s1667_s0 = inlined_call_operand.vmem [shape: f32[32,128], index: 0, kind: input, shape index: {}]   ;;  %s1668_s2 = inlined_call_operand.vmem [shape: f32[384,128], index: 2, kind: input, shape index: {}]   ;;  %s1669_s3 = inlined_call_operand.vmem [shape: f32[1,128], index: 3, kind: input, shape index: {}]   ;;  %s1670_s4 = inlined_call_operand.vmem [shape: f32[1,128], index: 4, kind: input, shape index: {}]   ;;  %s1671_s5 = inlined_call_operand.vmem [shape: f32[1,128], index: 5, kind: input, shape index: {}]   ;;  %s1672_s6 = inlined_call_operand.vmem [shape: f32[1,128], index: 6, kind: input, shape index: {}]   ;;  %s1673_s7 = inlined_call_operand.vmem [shape: f32[32,128], index: 7, kind: output, shape index: {}]  }
   0x1   :  { %v149_v0 = vld [vmem:[%s1666_s1 + $0x80] sm:$0xff]  ;;  %v150_v1 = vld [vmem:[%s1666_s1 + $0x88] sm:$0xff]  ;;  %v151_v9 = vld [vmem:[%s1666_s1 + $0x90] sm:$0xff] }
   0x2   :  { %v133_v2 = vld [vmem:[%s1666_s1] sm:$0xff]  ;;  %v996_v3 = vpack.c.bf16 %v150_v1, %v149_v0  ;;  %v134_v4 = vld [vmem:[%s1666_s1 + $0x8] sm:$0xff]  ;;  %v152_v10 = vld [vmem:[%s1666_s1 + $0x98] sm:$0xff]  ;;  %v1280_v49 = vshrl.u32 %v30_v39, 7 }
   0x3   :  { %v165_v5 = vld [vmem:[%s1666_s1 + $0x100] sm:$0xff]  ;;  %v166_v6 = vld [vmem:[%s1666_s1 + $0x108] sm:$0xff]  ;;  %v998_v7 = vpack.c.bf16 %v134_v4, %v133_v2  ;;  %v135_v11 = vld [vmem:[%s1666_s1 + $0x10] sm:$0xff]  ;;  %v1000_v12 = vpack.c.bf16 %v152_v10, %v151_v9 }
   0x4   :  { %v1028_v8 = vpack.c.bf16 %v166_v6, %v165_v5  ;;  %997 = vmatprep.subr.bf16.mxu0 %v996_v3  ;;  %v136_v13 = vld [vmem:[%s1666_s1 + $0x18] sm:$0xff]  ;;  %v167_v14 = vld [vmem:[%s1666_s1 + $0x110] sm:$0xff]  ;;  %v153_v18 = vld [vmem:[%s1666_s1 + $0xa0] sm:$0xff]  ;;  %vm116_vm0 = vcmp.lt.s32.totalorder %v1280_v49, 7  ;;  %vm95_vm1 = vcmp.lt.s32.totalorder %v1280_v49, 1 }
   0x5   :  { %v168_v15 = vld [vmem:[%s1666_s1 + $0x118] sm:$0xff]  ;;  %999 = vmatpush3.bf16.msra.mxu0 %v998_v7  ;;  %v1002_v16 = vpack.c.bf16 %v136_v13, %v135_v11  ;;  %v154_v19 = vld [vmem:[%s1666_s1 + $0xa8] sm:$0xff]  ;;  %v137_v20 = vld [vmem:[%s1666_s1 + $0x20] sm:$0xff] }
   0x6   :  { %1029 = vmatprep.subr.bf16.mxu1 %v1028_v8  ;;  %v1032_v17 = vpack.c.bf16 %v168_v15, %v167_v14  ;;  %1001 = vmatprep.subr.bf16.mxu0 %v1000_v12  ;;  %v1004_v21 = vpack.c.bf16 %v154_v19, %v153_v18  ;;  %v138_v22 = vld [vmem:[%s1666_s1 + $0x28] sm:$0xff]  ;;  %v169_v23 = vld [vmem:[%s1666_s1 + $0x120] sm:$0xff]  ;;  %v155_v26 = vld [vmem:[%s1666_s1 + $0xb0] sm:$0xff]  ;;  %v32_v14 = vadd.s32 8, %v1280_v49  ;;  %v39_v19 = vand.u32 15, %v1280_v49 }
   0x7   :  { %1031 = vmatpush3.bf16.msra.mxu1 %v1028_v8  ;;  %v170_v24 = vld [vmem:[%s1666_s1 + $0x128] sm:$0xff]  ;;  %v156_v27 = vld [vmem:[%s1666_s1 + $0xb8] sm:$0xff]  ;;  %v171_v28 = vld [vmem:[%s1666_s1 + $0x130] sm:$0xff]  ;;  %v1006_v30 = vpack.c.bf16 %v138_v22, %v137_v20 }
   0x8   :  { %1033 = vmatprep.subr.bf16.mxu1 %v1032_v17  ;;  %v1036_v25 = vpack.c.bf16 %v170_v24, %v169_v23  ;;  %v172_v29 = vld [vmem:[%s1666_s1 + $0x138] sm:$0xff]  ;;  %v1008_v31 = vpack.c.bf16 %v156_v27, %v155_v26  ;;  %v139_v32 = vld [vmem:[%s1666_s1 + $0x30] sm:$0xff]  ;;  %v157_v35 = vld [vmem:[%s1666_s1 + $0xc0] sm:$0xff]  ;;  %v34_v23 = vadd.s32 24, %v1280_v49  ;;  %vm1360_vm2 = vcmp.ne.s32.totalorder %v39_v19, 0 }
   0x9   :  { %1003 = vmatpush3.bf16.msra.mxu0 %v1002_v16  ;;  %v140_v33 = vld [vmem:[%s1666_s1 + $0x38] sm:$0xff]  ;;  %v1040_v34 = vpack.c.bf16 %v172_v29, %v171_v28  ;;  %v158_v36 = vld [vmem:[%s1666_s1 + $0xc8] sm:$0xff]  ;;  %v173_v37 = vld [vmem:[%s1666_s1 + $0x140] sm:$0xff]  ;;  %v33_v28 = vadd.s32 16, %v1280_v49 }
   0xa   :  { %1005 = vmatprep.subr.bf16.mxu0 %v1004_v21  ;;  %v174_v38 = vld [vmem:[%s1666_s1 + $0x148] sm:$0xff]  ;;  %v1010_v40 = vpack.c.bf16 %v140_v33, %v139_v32  ;;  %v1012_v41 = vpack.c.bf16 %v158_v36, %v157_v35  ;;  %v141_v42 = vld [vmem:[%s1666_s1 + $0x40] sm:$0xff]  ;;  %v159_v45 = vld [vmem:[%s1666_s1 + $0xd0] sm:$0xff]  ;;  %v46_v21 = vand.u32 15, %v32_v14 }
   0xb   :  { %1035 = vmatpush3.bf16.msra.mxu1 %v1032_v17  ;;  %v142_v43 = vld [vmem:[%s1666_s1 + $0x48] sm:$0xff]  ;;  %v1044_v44 = vpack.c.bf16 %v174_v38, %v173_v37  ;;  %v160_v46 = vld [vmem:[%s1666_s1 + $0xd8] sm:$0xff]  ;;  %v175_v47 = vld [vmem:[%s1666_s1 + $0x150] sm:$0xff] }
   0xc   :  { %1037 = vmatprep.subr.bf16.mxu1 %v1036_v25  ;;  %v176_v48 = vld [vmem:[%s1666_s1 + $0x158] sm:$0xff]  ;;  %v1014_v50 = vpack.c.bf16 %v142_v43, %v141_v42  ;;  %v1285_v51 = vld [vmem:[%s1667_s0] sm:$0xff]  ;;  %v1016_v52 = vpack.c.bf16 %v160_v46, %v159_v45  ;;  %v143_v53 = vld [vmem:[%s1666_s1 + $0x50] sm:$0xff]  ;;  %vm1368_vm3 = vcmp.ne.s32.totalorder %v46_v21, 15 }
   0xd   :  { %1007 = vmatpush3.bf16.msra.mxu0 %v1006_v30  ;;  %v144_v54 = vld [vmem:[%s1666_s1 + $0x58] sm:$0xff]  ;;  %v1296_v55 = vld [vmem:[%s1667_s0 + $0x8] sm:$0xff]  ;;  %v112_v56 = vrot.slane %v1285_v51, 1  ;;  %v1048_v57 = vpack.c.bf16 %v176_v48, %v175_v47  ;;  %v161_v58 = vld [vmem:[%s1666_s1 + $0xe0] sm:$0xff]  ;;  %245 = vmatprep.mubr.f32.mxu0 %v1285_v51  ;;  %v91_v18 = vrot.slane %v1285_v51, 7 }
   0xe   :  { %1009 = vmatprep.subr.bf16.mxu0 %v1008_v31  ;;  %v162_v59 = vld [vmem:[%s1666_s1 + $0xe8] sm:$0xff]  ;;  %v113_v60 = vrot.slane %v1296_v55, 1  ;;  %v177_v61 = vld [vmem:[%s1666_s1 + $0x160] sm:$0xff]  ;;  %v1018_v63 = vpack.c.bf16 %v144_v54, %v143_v53  ;;  %v163_v5 = vld [vmem:[%s1666_s1 + $0xf0] sm:$0xff]  ;;  %v92_v27 = vrot.slane %v1296_v55, 7  ;;  %v60_v31 = vand.u32 15, %v34_v23 }
   0xf   :  { %1039 = vmatpush3.bf16.msra.mxu1 %v1036_v25  ;;  %v178_v62 = vld [vmem:[%s1666_s1 + $0x168] sm:$0xff]  ;;  %v1020_v1 = vpack.c.bf16 %v162_v59, %v161_v58  ;;  %v145_v2 = vld [vmem:[%s1666_s1 + $0x60] sm:$0xff]  ;;  %v164_v6 = vld [vmem:[%s1666_s1 + $0xf8] sm:$0xff] }
  0x10   :  { %1041 = vmatprep.subr.bf16.mxu1 %v1040_v34  ;;  %v119_v0 = vsel %vm116_vm0, %v112_v56, %v113_v60  ;;  %v146_v3 = vld [vmem:[%s1666_s1 + $0x68] sm:$0xff]  ;;  %v1052_v4 = vpack.c.bf16 %v178_v62, %v177_v61  ;;  %v179_v7 = vld [vmem:[%s1666_s1 + $0x170] sm:$0xff]  ;;  %v180_v8 = vld [vmem:[%s1666_s1 + $0x178] sm:$0xff]  ;;  %v1024_v10 = vpack.c.bf16 %v164_v6, %v163_v5  ;;  %v98_v33 = vsel %vm95_vm1, %v91_v18, %v92_v27 }
  0x11   :  { %1011 = vmatpush3.bf16.msra.mxu0 %v1010_v40  ;;  %952 = vmatprep.mubr.f32.mxu1 %v119_v0  ;;  %v1022_v9 = vpack.c.bf16 %v146_v3, %v145_v2  ;;  %v147_v11 = vld [vmem:[%s1666_s1 + $0x70] sm:$0xff]  ;;  %v148_v12 = vld [vmem:[%s1666_s1 + $0x78] sm:$0xff]  ;;  %v1056_v15 = vpack.c.bf16 %v180_v8, %v179_v7  ;;  %vm1384_vm4 = vcmp.ne.s32.totalorder %v60_v31, 15  ;;  %s1134_s1 = smov 16   ;;  %v481_v31 = vld [vmem:[%s1668_s2 + $0x80] sm:$0xff] }
  0x12   :  { %1013 = vmatprep.subr.bf16.mxu0 %v1012_v41  ;;  %v1345_v13 = vld [vmem:[%s1667_s0 + $0x18] sm:$0xff]  ;;  %v1351_v16 = vld [vmem:[%s1667_s0 + $0x10] sm:$0xff]  ;;  %v1026_v17 = vpack.c.bf16 %v148_v12, %v147_v11  ;;  %s1133_s0 = smov 8  }
  0x13   :  { %1043 = vmatpush3.bf16.msra.mxu1 %v1040_v34  ;;  %v94_v20 = vrot.slane %v1345_v13, 7  ;;  %v114_v22 = vrot.slane %v1351_v16, 1  ;;  %v115_v24 = vrot.slane %v1345_v13, 1  ;;  %v53_v34 = vand.u32 15, %v33_v28 }
  0x14   :  { %1045 = vmatprep.subr.bf16.mxu1 %v1044_v44  ;;  %v93_v35 = vrot.slane %v1351_v16, 7 }
  0x15   :  { %1015 = vmatpush3.bf16.msra.mxu0 %v1014_v50  ;;  %v99_v26 = vsel %vm95_vm1, %v94_v20, %v91_v18  ;;  %v118_v30 = vsel %vm116_vm0, %v113_v60, %v114_v22  ;;  %v117_v32 = vsel %vm116_vm0, %v114_v22, %v115_v24  ;;  %v120_v37 = vsel %vm116_vm0, %v115_v24, %v112_v56 }
  0x16   :  { %1017 = vmatprep.subr.bf16.mxu0 %v1016_v52  ;;  %vm1393_vm5 = vcmp.ne.s32.totalorder %v53_v34, 0  ;;  %v97_v39 = vsel %vm95_vm1, %v92_v27, %v93_v35  ;;  %v96_v40 = vsel %vm95_vm1, %v93_v35, %v94_v20  ;;  %v465_v35 = vld [vmem:[%s1668_s2] sm:$0xff] }
  0x17   :  { %1047 = vmatpush3.bf16.msra.mxu1 %v1044_v44 }
  0x18   :  { %1049 = vmatprep.subr.bf16.mxu1 %v1048_v57 }
  0x19   :  { %1019 = vmatpush3.bf16.msra.mxu0 %v1018_v63 }
  0x1a   :  { %1021 = vmatprep.subr.bf16.mxu0 %v1020_v1 }
  0x1b   :  { %1051 = vmatpush3.bf16.msra.mxu1 %v1048_v57 }
  0x1c   :  { %1053 = vmatprep.subr.bf16.mxu1 %v1052_v4 }
  0x1d   :  { %1023 = vmatpush3.bf16.msra.mxu0 %v1022_v9 }
  0x1e   :  { %1025 = vmatprep.subr.bf16.mxu0 %v1024_v10 }
  0x1f   :  { %1055 = vmatpush3.bf16.msra.mxu1 %v1052_v4 }
  0x20   :  { %1057 = vmatprep.subr.bf16.mxu1 %v1056_v15 }
  0x21   :  { %1027 = vmatpush3.bf16.msra.mxu0 %v1026_v17 }
  0x23   :  { %1059 = vmatpush3.bf16.msra.mxu1 %v1056_v15 }
  0x24   :  { %784 = vmatmul.mubr.msk.f32.vlgmr.msra.gmra.mrb[0].mxu0 %vm1360_vm2, %v99_v26 }
  0x25   :  { %250 = vmatprep.mubr.f32.mxu0 %v1296_v55 }
  0x26   :  { %953 = vmatmul.mubr.msk.f32.vlgmr.msra.gmra.mrb[0].mxu1 %vm1368_vm3, %v118_v30 }
  0x27   :  { %955 = vmatprep.mubr.f32.mxu1 %v117_v32  ;;  %v482_v32 = vld [vmem:[%s1668_s2 + $0x88] sm:$0xff] }
  0x28   :  { %251 = vmatmul.mubr.f32.gmra.mrb[2].mxu0 %v98_v33  ;;  %v1060_v34 = vpack.c.bf16 %v482_v32, %v481_v31  ;;  %v476_v31 = vld [vmem:[%s1668_s2 + $0x58] sm:$0xff]  ;;  %v507_v32 = vld [vmem:[%s1668_s2 + $0x150] sm:$0xff] }
  0x29   :  { %255 = vmatprep.mubr.f32.mxu0 %v1351_v16 }
  0x2a   :  { %956 = vmatmul.mubr.msk.f32.gmra.mrb[2].mxu1 %vm1384_vm4, %v120_v37  ;;  %v466_v37 = vld [vmem:[%s1668_s2 + $0x8] sm:$0xff]  ;;  %1061 = vmatprep.subr.bf16.mxu0 %v1060_v34  ;;  %v508_v34 = vld [vmem:[%s1668_s2 + $0x158] sm:$0xff] }
  0x2c   :  { %785 = vmatmul.mubr.msk.f32.gmra.mrb[4].mxu0 %vm1393_vm5, %v97_v39  ;;  %v497_v39 = vld [vmem:[%s1668_s2 + $0x100] sm:$0xff] }
  0x2d   :  { %260 = vmatprep.mubr.f32.mxu0 %v1345_v13 }
  0x30   :  { %261 = vmatmul.mubr.f32.gmra.mrb[6].mxu0 %v96_v40 }
  0xf7   :  { %v824_v41 = vpop.f32.mrb[0].mxu0 }
  0xf8   :  { %v825_v42 = vpop.f32.mrb[1].mxu0 }
  0xf9   :  { %v954_v43 = vpop.f32.mrb[0].mxu1  ;;  %v826_v44 = vadd.f32 %v825_v42, %v824_v41  ;;  %v1062_v41 = vpack.c.bf16 %v466_v37, %v465_v35  ;;  %v498_v42 = vld [vmem:[%s1668_s2 + $0x108] sm:$0xff]  ;;  %v1112_v35 = vpack.c.bf16 %v508_v34, %v507_v32  ;;  %v493_v37 = vld [vmem:[%s1668_s2 + $0xe0] sm:$0xff] }
  0xfa   :  { %v332_v45 = vpop.f32.mrb[1].mxu1 }
  0xfb   :  { %v1406_v46 = vadd.f32 %v826_v44, %v332_v45  ;;  %v827_v47 = vpop.f32.mrb[2].mxu0  ;;  %1063 = vmatpush3.bf16.msra.mxu0 %v1062_v41  ;;  %v483_v44 = vld [vmem:[%s1668_s2 + $0x90] sm:$0xff]  ;;  %v484_v45 = vld [vmem:[%s1668_s2 + $0x98] sm:$0xff] }
  0xfc   :  { %v828_v48 = vpop.f32.mrb[3].mxu0 }
  0xfd   :  { %v957_v50 = vpop.f32.mrb[2].mxu1  ;;  %v829_v52 = vadd.f32 %v828_v48, %v827_v47  ;;  %v362_v63 = vmul.f32 %v1406_v46, %v1406_v46  ;;  %v1064_v47 = vpack.c.bf16 %v484_v45, %v483_v44  ;;  %v467_v48 = vld [vmem:[%s1668_s2 + $0x10] sm:$0xff]  ;;  %v509_v44 = vld [vmem:[%s1668_s2 + $0x160] sm:$0xff] }
  0xfe   :  { %v342_v53 = vpop.f32.mrb[3].mxu1 }
  0xff   :  { %v1408_v54 = vadd.f32 %v954_v43, %v829_v52  ;;  %v830_v56 = vpop.f32.mrb[4].mxu0  ;;  %v1092_v43 = vpack.c.bf16 %v498_v42, %v497_v39  ;;  %v499_v52 = vld [vmem:[%s1668_s2 + $0x110] sm:$0xff]  ;;  %1065 = vmatprep.subr.bf16.mxu0 %v1064_v47  ;;  %v494_v39 = vld [vmem:[%s1668_s2 + $0xe8] sm:$0xff]  ;;  %v477_v42 = vld [vmem:[%s1668_s2 + $0x60] sm:$0xff] }
 0x100   :  { %v831_v57 = vpop.f32.mrb[5].mxu0  ;;  %v1084_v41 = vpack.c.bf16 %v494_v39, %v493_v37  ;;  %v510_v47 = vld [vmem:[%s1668_s2 + $0x168] sm:$0xff] }
 0x101   :  { %v832_v58 = vadd.f32 %v831_v57, %v830_v56  ;;  %v363_v59 = vmul.f32 %v1408_v54, %v1408_v54  ;;  %v353_v0 = vadd.f32 %v1408_v54, %v1406_v46  ;;  %1093 = vmatprep.subr.bf16.mxu1 %v1092_v43  ;;  %v500_v56 = vld [vmem:[%s1668_s2 + $0x118] sm:$0xff] }
 0x102   :  { %1095 = vmatpush3.bf16.msra.mxu1 %v1092_v43  ;;  %v1096_v57 = vpack.c.bf16 %v500_v56, %v499_v52  ;;  %v478_v43 = vld [vmem:[%s1668_s2 + $0x68] sm:$0xff]  ;;  %v496_v52 = vld [vmem:[%s1668_s2 + $0xf8] sm:$0xff] }
 0x103   :  { %v1412_v60 = vadd.f32 %v832_v58, %v342_v53  ;;  %v833_v61 = vpop.f32.mrb[6].mxu0  ;;  %v366_v4 = vadd.f32 %v363_v59, %v362_v63  ;;  %v485_v58 = vld [vmem:[%s1668_s2 + $0xa0] sm:$0xff]  ;;  %v486_v59 = vld [vmem:[%s1668_s2 + $0xa8] sm:$0xff]  ;;  %v1086_v45 = vpack.c.bf16 %v478_v43, %v477_v42 }
 0x104   :  { %v834_v62 = vpop.f32.mrb[7].mxu0  ;;  %1097 = vmatprep.subr.bf16.mxu1 %v1096_v57  ;;  %v470_v63 = vld [vmem:[%s1668_s2 + $0x28] sm:$0xff] }
 0x105   :  { %v364_v1 = vmul.f32 %v1412_v60, %v1412_v60  ;;  %v835_v2 = vadd.f32 %v834_v62, %v833_v61  ;;  %v354_v3 = vadd.f32 %v353_v0, %v1412_v60  ;;  %v1068_v61 = vpack.c.bf16 %v486_v59, %v485_v58  ;;  %v469_v62 = vld [vmem:[%s1668_s2 + $0x20] sm:$0xff]  ;;  %v511_v58 = vld [vmem:[%s1668_s2 + $0x170] sm:$0xff]  ;;  %v512_v59 = vld [vmem:[%s1668_s2 + $0x178] sm:$0xff] }
 0x106   :  { %v501_v0 = vld [vmem:[%s1668_s2 + $0x120] sm:$0xff]  ;;  %1099 = vmatpush3.bf16.msra.mxu1 %v1096_v57  ;;  %v480_v57 = vld [vmem:[%s1668_s2 + $0x78] sm:$0xff] }
 0x107   :  { %v1421_v5 = vadd.f32 %v957_v50, %v835_v2  ;;  %v367_v6 = vadd.f32 %v366_v4, %v364_v1  ;;  %v468_v50 = vld [vmem:[%s1668_s2 + $0x18] sm:$0xff]  ;;  %v1070_v1 = vpack.c.bf16 %v470_v63, %v469_v62  ;;  %v502_v2 = vld [vmem:[%s1668_s2 + $0x128] sm:$0xff]  ;;  %v487_v4 = vld [vmem:[%s1668_s2 + $0xb0] sm:$0xff]  ;;  %v1120_v62 = vpack.c.bf16 %v512_v59, %v511_v58 }
 0x108   :  { %v1066_v53 = vpack.c.bf16 %v468_v50, %v467_v48  ;;  %v1116_v48 = vpack.c.bf16 %v510_v47, %v509_v44  ;;  %v495_v50 = vld [vmem:[%s1668_s2 + $0xf0] sm:$0xff] }
 0x109   :  { %v355_v7 = vadd.f32 %v354_v3, %v1421_v5  ;;  %v365_v8 = vmul.f32 %v1421_v5, %v1421_v5  ;;  %v1100_v3 = vpack.c.bf16 %v502_v2, %v501_v0  ;;  %v1088_v56 = vpack.c.bf16 %v496_v52, %v495_v50 }
 0x10a   :  { %1067 = vmatpush3.bf16.msra.mxu0 %v1066_v53  ;;  %v479_v53 = vld [vmem:[%s1668_s2 + $0x70] sm:$0xff] }
 0x10b   :  { %v356_v9 = vrot.slane %v355_v7, 4  ;;  %v368_v10 = vadd.f32 %v367_v6, %v365_v8  ;;  %1069 = vmatprep.subr.bf16.mxu0 %v1068_v61  ;;  %v488_v6 = vld [vmem:[%s1668_s2 + $0xb8] sm:$0xff]  ;;  %1101 = vmatprep.subr.bf16.mxu1 %v1100_v3  ;;  %v471_v8 = vld [vmem:[%s1668_s2 + $0x30] sm:$0xff]  ;;  %v1090_v61 = vpack.c.bf16 %v480_v57, %v479_v53 }
 0x10c   :  { %1103 = vmatpush3.bf16.msra.mxu1 %v1100_v3 }
 0x10d   :  { %v357_v11 = vadd.f32 %v356_v9, %v355_v7  ;;  %v369_v12 = vrot.slane %v368_v10, 4  ;;  %v1072_v7 = vpack.c.bf16 %v488_v6, %v487_v4  ;;  %v472_v9 = vld [vmem:[%s1668_s2 + $0x38] sm:$0xff] }
 0x10e   :  { %1071 = vmatpush3.bf16.msra.mxu0 %v1070_v1 }
 0x10f   :  { %v358_v14 = vrot.slane %v357_v11, 2  ;;  %v370_v15 = vadd.f32 %v369_v12, %v368_v10  ;;  %v503_v10 = vld [vmem:[%s1668_s2 + $0x130] sm:$0xff]  ;;  %v504_v12 = vld [vmem:[%s1668_s2 + $0x138] sm:$0xff]  ;;  %1073 = vmatprep.subr.bf16.mxu0 %v1072_v7  ;;  %v1137_v7 = vmov 1966171168  }
 0x111   :  { %v359_v17 = vadd.f32 %v358_v14, %v357_v11  ;;  %v371_v18 = vrot.slane %v370_v15, 2  ;;  %v1074_v11 = vpack.c.bf16 %v472_v9, %v471_v8  ;;  %v1104_v14 = vpack.c.bf16 %v504_v12, %v503_v10 }
 0x112   :  { %v399_v8 = vunpack.c.l.s4 %v1137_v7 }
 0x113   :  { %v360_v19 = vrot.slane %v359_v17, 1  ;;  %v372_v20 = vadd.f32 %v371_v18, %v370_v15  ;;  %1075 = vmatpush3.bf16.msra.mxu0 %v1074_v11  ;;  %v489_v15 = vld [vmem:[%s1668_s2 + $0xc0] sm:$0xff]  ;;  %1105 = vmatprep.subr.bf16.mxu1 %v1104_v14 }
 0x114   :  { %1107 = vmatpush3.bf16.msra.mxu1 %v1104_v14  ;;  %v400_v9 = vunpack.c.0.s8 %v399_v8 }
 0x115   :  { %v373_v21 = vrot.slane %v372_v20, 1  ;;  %v361_v22 = vadd.f32 %v360_v19, %v359_v17  ;;  %v490_v17 = vld [vmem:[%s1668_s2 + $0xc8] sm:$0xff]  ;;  %v473_v19 = vld [vmem:[%s1668_s2 + $0x40] sm:$0xff] }
 0x116   :  { %v1076_v18 = vpack.c.bf16 %v490_v17, %v489_v15  ;;  %v1580_v10 = vsub.s32 %v400_v9, %v1280_v49  ;;  %v1587_v15 = vsub.s32 0, %v1280_v49 }
 0x117   :  { %v374_v23 = vadd.f32 %v373_v21, %v372_v20  ;;  %v474_v20 = vld [vmem:[%s1668_s2 + $0x48] sm:$0xff]  ;;  %v505_v21 = vld [vmem:[%s1668_s2 + $0x140] sm:$0xff] }
 0x118   :  { %1077 = vmatprep.subr.bf16.mxu0 %v1076_v18 }
 0x119   :  { %v376_v24 = vsel %vm375_vm6, %v361_v22, %v374_v23  ;;  %v1078_v22 = vpack.c.bf16 %v474_v20, %v473_v19  ;;  %v506_v23 = vld [vmem:[%s1668_s2 + $0x148] sm:$0xff]  ;;  %v352_v19 = vld [vmem:[%s1670_s4] sm:$0x1] }
 0x11a   :  { %377 = vrot.lane.b32.xlu0 %v376_v24, %s1133_s0 }
 0x11b   :  { %1079 = vmatpush3.bf16.msra.mxu0 %v1078_v22 }
 0x18c   :  { %v378_v26 = vpop.permute.xlu0 %377 }
 0x18d   :  { %v379_v27 = vadd.f32 %v378_v26, %v376_v24  ;;  %v1108_v24 = vpack.c.bf16 %v506_v23, %v505_v21  ;;  %v491_v26 = vld [vmem:[%s1668_s2 + $0xd0] sm:$0xff] }
 0x18f   :  { %380 = vrot.lane.b32.xlu0 %v379_v27, %s1134_s1  ;;  %1109 = vmatprep.subr.bf16.mxu1 %v1108_v24 }
 0x190   :  { %1111 = vmatpush3.bf16.msra.mxu1 %v1108_v24 }
 0x191   :  { %1113 = vmatprep.subr.bf16.mxu1 %v1112_v35 }
 0x194   :  { %1115 = vmatpush3.bf16.msra.mxu1 %v1112_v35 }
 0x195   :  { %1117 = vmatprep.subr.bf16.mxu1 %v1116_v48 }
 0x198   :  { %1119 = vmatpush3.bf16.msra.mxu1 %v1116_v48 }
 0x199   :  { %1121 = vmatprep.subr.bf16.mxu1 %v1120_v62 }
 0x19c   :  { %1123 = vmatpush3.bf16.msra.mxu1 %v1120_v62 }
 0x201   :  { %v381_v28 = vpop.permute.xlu0 %380 }
 0x202   :  { %v382_v30 = vadd.f32 %v381_v28, %v379_v27  ;;  %v492_v27 = vld [vmem:[%s1668_s2 + $0xd8] sm:$0xff] }
 0x203   :  { %v1080_v28 = vpack.c.bf16 %v492_v27, %v491_v26 }
 0x204   :  { %383 = vrot.lane.b32.xlu1 %v382_v30, %s1135_s13 }
 0x205   :  { %1081 = vmatprep.subr.bf16.mxu0 %v1080_v28 }
 0x276   :  { %v384_v33 = vpop.permute.xlu1 %383 }
 0x277   :  { %v1445_v40 = vadd.f32 %v384_v33, %v382_v30  ;;  %v475_v30 = vld [vmem:[%s1668_s2 + $0x50] sm:$0xff] }
 0x278   :  { %v1082_v33 = vpack.c.bf16 %v476_v31, %v475_v30 }
 0x279   :  { %386 = vrot.lane.b32.xlu1 %v1445_v40, %s1136_s26 }
 0x27a   :  { %1083 = vmatpush3.bf16.msra.mxu0 %v1082_v33 }
 0x27b   :  { %1085 = vmatprep.subr.bf16.mxu0 %v1084_v41 }
 0x27e   :  { %1087 = vmatpush3.bf16.msra.mxu0 %v1086_v45 }
 0x27f   :  { %1089 = vmatprep.subr.bf16.mxu0 %v1088_v56 }
 0x282   :  { %1091 = vmatpush3.bf16.msra.mxu0 %v1090_v61 }
 0x2eb   :  { %v387_v63 = vpop.permute.xlu1 %386 }
 0x2ec   :  { %v388_v0 = vadd.f32 %v387_v63, %v1445_v40  ;;  %v351_v40 = vld [vmem:[%s1669_s3] sm:$0x1] }
 0x2ee   :  { %v389_v1 = vmul.f32 0.001953125, %v388_v0 }
 0x2f0   :  { %v390_v2 = vmul.f32 %v389_v1, %v389_v1 }
 0x2f2   :  { %v392_v3 = vrot.slane %v390_v2, 7 }
 0x2f4   :  { %v394_v4 = vsub.f32 %v389_v1, %v392_v3 }
 0x2f6   :  { %v395_v6 = vadd.f32 1e-05, %v394_v4 }
 0x2f8   :  { %1129 = vrsqrt.f32 %v395_v6 }
 0x302   :  { %v1130_v11 = vpop.eup %1129 }
 0x303   :  { %v404_v12 = vrot.slane %v1130_v11, %v1580_v10 }
 0x305   :  { %v405_v14 = vcombine.high %v404_v12, %v404_v12 }
 0x307   :  { %v412_v17 = vrot.slane %v405_v14, %v1580_v10 }
 0x309   :  { %v414_v18 = vmul.f32 %v412_v17, %v351_v40 }
 0x30b   :  { %v419_v20 = vrot.slane %v414_v18, %v1587_v15  ;;  %v425_v21 = vmul.f32 %v414_v18, %v389_v1 }
 0x30d   :  { %v426_v22 = vsub.f32 %v352_v19, %v425_v21  ;;  %v423_v23 = vmul.f32 %v419_v20, %v1412_v60  ;;  %v424_v24 = vmul.f32 %v419_v20, %v1421_v5  ;;  %v421_v27 = vmul.f32 %v419_v20, %v1406_v46 }
 0x30e   :  { %v422_v28 = vmul.f32 %v419_v20, %v1408_v54 }
 0x30f   :  { %v431_v26 = vrot.slane %v426_v22, %v1587_v15 }
 0x311   :  { %v435_v30 = vadd.f32 %v431_v26, %v423_v23  ;;  %v436_v31 = vadd.f32 %v431_v26, %v424_v24  ;;  %v433_v32 = vadd.f32 %v431_v26, %v421_v27  ;;  %v434_v33 = vadd.f32 %v431_v26, %v422_v28 }
 0x313   :  { %v437_v34 = vmax.f32 %v433_v32, 0.0  ;;  %v440_v35 = vmax.f32 %v436_v31, 0.0  ;;  %v438_v37 = vmax.f32 %v434_v33, 0.0  ;;  %v439_v39 = vmax.f32 %v435_v30, 0.0 }
 0x315   :  { %v441_v41 = vrot.slane %v437_v34, 7  ;;  %577 = vmatprep.mubr.f32.mxu0 %v437_v34  ;;  %v444_v42 = vrot.slane %v440_v35, 7  ;;  %v453_v60 = vrot.slane %v437_v34, 1  ;;  %v454_v43 = vrot.slane %v438_v37, 1 }
 0x316   :  { %v455_v5 = vrot.slane %v439_v39, 1  ;;  %v456_v44 = vrot.slane %v440_v35, 1  ;;  %v442_v45 = vrot.slane %v438_v37, 7  ;;  %v443_v52 = vrot.slane %v439_v39, 7 }
 0x317   :  { %v448_v46 = vsel %vm95_vm1, %v444_v42, %v441_v41  ;;  %v459_v54 = vsel %vm116_vm0, %v453_v60, %v454_v43 }
 0x318   :  { %788 = vmatmul.mubr.msk.f32.vlgmr.msra.gmra.mrb[8].mxu0 %vm1360_vm2, %v448_v46  ;;  %990 = vmatprep.mubr.f32.mxu1 %v459_v54  ;;  %v458_v47 = vsel %vm116_vm0, %v454_v43, %v455_v5  ;;  %v457_v48 = vsel %vm116_vm0, %v455_v5, %v456_v44  ;;  %v447_v50 = vsel %vm95_vm1, %v441_v41, %v442_v45 }
 0x319   :  { %582 = vmatprep.mubr.f32.mxu0 %v438_v37  ;;  %991 = vmatmul.mubr.msk.f32.vlgmr.msra.gmra.mrb[4].mxu1 %vm1368_vm3, %v458_v47  ;;  %v460_v25 = vsel %vm116_vm0, %v456_v44, %v453_v60  ;;  %v446_v29 = vsel %vm95_vm1, %v442_v45, %v443_v52  ;;  %v445_v53 = vsel %vm95_vm1, %v443_v52, %v444_v42 }
 0x31a   :  { %993 = vmatprep.mubr.f32.mxu1 %v457_v48 }
 0x31c   :  { %583 = vmatmul.mubr.f32.gmra.mrb[10].mxu0 %v447_v50 }
 0x31d   :  { %587 = vmatprep.mubr.f32.mxu0 %v439_v39  ;;  %994 = vmatmul.mubr.msk.f32.gmra.mrb[6].mxu1 %vm1384_vm4, %v460_v25 }
 0x320   :  { %789 = vmatmul.mubr.msk.f32.gmra.mrb[12].mxu0 %vm1393_vm5, %v446_v29 }
 0x321   :  { %592 = vmatprep.mubr.f32.mxu0 %v440_v35 }
 0x324   :  { %593 = vmatmul.mubr.f32.gmra.mrb[14].mxu0 %v445_v53 }
 0x3eb   :  { %v888_v56 = vpop.f32.mrb[8].mxu0 }
 0x3ec   :  { %v889_v57 = vpop.f32.mrb[9].mxu0  ;;  %v992_v58 = vpop.f32.mrb[4].mxu1 }
 0x3ed   :  { %v890_v59 = vadd.f32 %v889_v57, %v888_v56  ;;  %v664_v61 = vpop.f32.mrb[5].mxu1  ;;  %v683_v57 = vld [vmem:[%s1671_s5] sm:$0x1] }
 0x3ef   :  { %v1623_v62 = vadd.f32 %v890_v59, %v664_v61  ;;  %v891_v36 = vpop.f32.mrb[10].mxu0  ;;  %v684_v61 = vld [vmem:[%s1672_s6] sm:$0x1] }
 0x3f0   :  { %v892_v63 = vpop.f32.mrb[11].mxu0  ;;  %v995_v0 = vpop.f32.mrb[6].mxu1 }
 0x3f1   :  { %v893_v1 = vadd.f32 %v892_v63, %v891_v36  ;;  %v674_v2 = vpop.f32.mrb[7].mxu1  ;;  %v694_v11 = vmul.f32 %v1623_v62, %v1623_v62 }
 0x3f3   :  { %v1625_v3 = vadd.f32 %v992_v58, %v893_v1  ;;  %v894_v38 = vpop.f32.mrb[12].mxu0 }
 0x3f4   :  { %v895_v4 = vpop.f32.mrb[13].mxu0 }
 0x3f5   :  { %v896_v6 = vadd.f32 %v895_v4, %v894_v38  ;;  %v695_v49 = vmul.f32 %v1625_v3, %v1625_v3  ;;  %v685_v12 = vadd.f32 %v1625_v3, %v1623_v62 }
 0x3f7   :  { %v675_v7 = vadd.f32 %v896_v6, %v674_v2  ;;  %v897_v8 = vpop.f32.mrb[14].mxu0  ;;  %v698_v17 = vadd.f32 %v695_v49, %v694_v11 }
 0x3f8   :  { %v898_v9 = vpop.f32.mrb[15].mxu0 }
 0x3f9   :  { %v696_v14 = vmul.f32 %v675_v7, %v675_v7  ;;  %v899_v40 = vadd.f32 %v898_v9, %v897_v8  ;;  %v686_v18 = vadd.f32 %v685_v12, %v675_v7 }
 0x3fb   :  { %v680_v19 = vadd.f32 %v995_v0, %v899_v40  ;;  %v699_v20 = vadd.f32 %v698_v17, %v696_v14 }
 0x3fd   :  { %v687_v21 = vadd.f32 %v686_v18, %v680_v19  ;;  %v697_v22 = vmul.f32 %v680_v19, %v680_v19 }
 0x3ff   :  { %v688_v23 = vrot.slane %v687_v21, 4  ;;  %v700_v24 = vadd.f32 %v699_v20, %v697_v22 }
 0x401   :  { %v689_v26 = vadd.f32 %v688_v23, %v687_v21  ;;  %v701_v27 = vrot.slane %v700_v24, 4 }
 0x403   :  { %v690_v28 = vrot.slane %v689_v26, 2  ;;  %v702_v30 = vadd.f32 %v701_v27, %v700_v24 }
 0x405   :  { %v691_v31 = vadd.f32 %v690_v28, %v689_v26  ;;  %v703_v32 = vrot.slane %v702_v30, 2 }
 0x407   :  { %v692_v33 = vrot.slane %v691_v31, 1  ;;  %v704_v34 = vadd.f32 %v703_v32, %v702_v30 }
 0x409   :  { %v705_v35 = vrot.slane %v704_v34, 1  ;;  %v693_v37 = vadd.f32 %v692_v33, %v691_v31 }
 0x40b   :  { %v706_v39 = vadd.f32 %v705_v35, %v704_v34 }
 0x40d   :  { %v707_v41 = vsel %vm375_vm6, %v693_v37, %v706_v39 }
 0x40e   :  { %708 = vrot.lane.b32.xlu0 %v707_v41, %s1133_s0 }
 0x480   :  { %v709_v42 = vpop.permute.xlu0 %708 }
 0x481   :  { %v710_v60 = vadd.f32 %v709_v42, %v707_v41 }
 0x483   :  { %711 = vrot.lane.b32.xlu1 %v710_v60, %s1134_s1 }
 0x4f5   :  { %v712_v43 = vpop.permute.xlu1 %711 }
 0x4f6   :  { %v713_v5 = vadd.f32 %v712_v43, %v710_v60 }
 0x4f8   :  { %714 = vrot.lane.b32.xlu0 %v713_v5, %s1135_s13 }
 0x56a   :  { %v715_v44 = vpop.permute.xlu0 %714 }
 0x56b   :  { %v716_v46 = vadd.f32 %v715_v44, %v713_v5 }
 0x56d   :  { %717 = vrot.lane.b32.xlu1 %v716_v46, %s1136_s26 }
 0x5df   :  { %v718_v54 = vpop.permute.xlu1 %717 }
 0x5e0   :  { %v719_v45 = vadd.f32 %v718_v54, %v716_v46 }
 0x5e2   :  { %v720_v47 = vmul.f32 0.001953125, %v719_v45 }
 0x5e4   :  { %v721_v48 = vmul.f32 %v720_v47, %v720_v47 }
 0x5e6   :  { %v723_v50 = vrot.slane %v721_v48, 7 }
 0x5e8   :  { %v725_v52 = vsub.f32 %v720_v47, %v723_v50 }
 0x5ea   :  { %v726_v25 = vadd.f32 1e-05, %v725_v52 }
 0x5ec   :  { %1131 = vrsqrt.f32 %v726_v25 }
 0x5f6   :  { %v1132_v29 = vpop.eup %1131 }
 0x5f7   :  { %v735_v53 = vrot.slane %v1132_v29, %v1580_v10 }
 0x5f9   :  { %v736_v56 = vcombine.high %v735_v53, %v735_v53 }
 0x5fb   :  { %v743_v58 = vrot.slane %v736_v56, %v1580_v10 }
 0x5fd   :  { %v745_v59 = vmul.f32 %v743_v58, %v683_v57 }
 0x5ff   :  { %v750_v36 = vrot.slane %v745_v59, %v1587_v15  ;;  %v756_v63 = vmul.f32 %v745_v59, %v720_v47 }
 0x601   :  { %v757_v0 = vsub.f32 %v684_v61, %v756_v63  ;;  %v752_v1 = vmul.f32 %v750_v36, %v1623_v62  ;;  %v753_v2 = vmul.f32 %v750_v36, %v1625_v3  ;;  %v754_v38 = vmul.f32 %v750_v36, %v675_v7 }
 0x602   :  { %v755_v4 = vmul.f32 %v750_v36, %v680_v19 }
 0x603   :  { %v762_v6 = vrot.slane %v757_v0, %v1587_v15 }
 0x605   :  { %v764_v49 = vadd.f32 %v762_v6, %v752_v1  ;;  %v765_v8 = vadd.f32 %v762_v6, %v753_v2  ;;  %v766_v10 = vadd.f32 %v762_v6, %v754_v38  ;;  %v767_v9 = vadd.f32 %v762_v6, %v755_v4 }
 0x607   :  { %v768_v11 = vadd.f32 %v764_v49, %v1285_v51  ;;  %v769_v12 = vadd.f32 %v765_v8, %v1296_v55  ;;  %v770_v14 = vadd.f32 %v766_v10, %v1351_v16  ;;  %v771_v40 = vadd.f32 %v767_v9, %v1345_v13 }
 0x609   :  { %v772_v17 = vmax.f32 %v768_v11, 0.0  ;;  %v773_v62 = vmax.f32 %v769_v12, 0.0  ;;  %v774_v18 = vmax.f32 %v770_v14, 0.0  ;;  %v775_v3 = vmax.f32 %v771_v40, 0.0 }
 0x60b   :  { %776 = vst [vmem:[%s1673_s7] sm:$0xff] %v772_v17  ;;  %777 = vst [vmem:[%s1673_s7 + $0x8] sm:$0xff] %v773_v62 }
 0x60c   :  { %778 = vst [vmem:[%s1673_s7 + $0x10] sm:$0xff] %v774_v18  ;;  %779 = vst [vmem:[%s1673_s7 + $0x18] sm:$0xff] %v775_v3 }

</bundles_post_ra>
